<compile_context>
chip_gen: v7x
topology: tpu7x:2x2x1
jax: 0.10.0
libtpu: 0.0.40
codegen_flags: <defaults>
</compile_context>

<pallas_src>
import functools

import jax
import jax.numpy as jnp
from jax.experimental import pallas as pl
from jax.experimental.pallas import tpu as pltpu


def _round_up(n: int, m: int) -> int:
    return ((n + m - 1) // m) * m


def _mlp_kernel(x_ref, w1_ref, b1_ref, w2_ref, b2_ref, o_ref):
    # x: (TILE_B, in) f32, w1: (in, Hp) bf16, b1: (1, Hp) f32,
    # w2: (Hp, out) bf16, b2: (1, out) f32, o: (TILE_B, out) f32.
    x = x_ref[...].astype(jnp.bfloat16)          # VPU cast, feeds the MXU
    # Hidden layer on the MXU, accumulate in f32.
    h = jnp.dot(x, w1_ref[...], preferred_element_type=jnp.float32)
    # Bias + ReLU in f32 on the VPU (avoids bf16 elementwise on v5e).
    h = jnp.maximum(h + b1_ref[...], 0.0)
    # Second matmul: bf16 operands, f32 accumulation.
    y = jnp.dot(h.astype(jnp.bfloat16), w2_ref[...],
                preferred_element_type=jnp.float32)
    o_ref[...] = (y + b2_ref[...]).astype(o_ref.dtype)


@functools.partial(jax.jit, static_argnames=("tile_b",))
def plant_model_forward(x, w1, b1, w2, b2, *, tile_b: int = 4096):
    """Fused forward pass of PlantModel.

    Args:
      x:  [B, inputSize]            float32
      w1: [inputSize, hiddenSize]   (transposed from PyTorch [hidden, in])
      b1: [hiddenSize] or [1, hiddenSize]
      w2: [hiddenSize, outputSize]  (transposed from PyTorch [out, hidden])
      b2: [outputSize] or [1, outputSize]
    Returns:
      [B, outputSize] float32
    """
    B, in_size = x.shape
    hidden = w1.shape[1]
    out_size = w2.shape[1]

    b1 = b1.reshape(1, hidden).astype(jnp.float32)
    b2 = b2.reshape(1, out_size).astype(jnp.float32)

    # Hidden dim padded to a lane multiple (internal to the kernel only).
    hid_p = _round_up(hidden, 128)

    # Batch tile: big enough to amortize per-step overhead, clamped for small
    # B, always a multiple of 8 (sublane constraint).
    tb = min(tile_b, _round_up(B, 8))
    tb = _round_up(tb, 8)
    B_p = _round_up(B, tb)

    f32 = jnp.float32
    bf16 = jnp.bfloat16

    # Zero padding keeps the math exact: padded hidden columns get zero
    # weight/bias (relu(0)=0) and padded batch rows are sliced off at the end.
    x_p = jnp.pad(x, ((0, B_p - B), (0, 0)))
    w1_p = jnp.pad(w1.astype(bf16), ((0, 0), (0, hid_p - hidden)))
    b1_p = jnp.pad(b1, ((0, 0), (0, hid_p - hidden)))
    w2_p = jnp.pad(w2.astype(bf16), ((0, hid_p - hidden), (0, 0)))

    grid = (B_p // tb,)

    out_padded = pl.pallas_call(
        _mlp_kernel,
        out_shape=jax.ShapeDtypeStruct((B_p, out_size), f32),
        grid_spec=pltpu.PrefetchScalarGridSpec(
            num_scalar_prefetch=0,
            grid=grid,
            in_specs=[
                pl.BlockSpec((tb, in_size), lambda i: (i, 0)),        # x tile
                pl.BlockSpec((in_size, hid_p), lambda i: (0, 0)),     # W1 (resident)
                pl.BlockSpec((1, hid_p), lambda i: (0, 0)),           # b1 (resident)
                pl.BlockSpec((hid_p, out_size), lambda i: (0, 0)),    # W2 (resident)
                pl.BlockSpec((1, out_size), lambda i: (0, 0)),        # b2 (resident)
            ],
            out_specs=pl.BlockSpec((tb, out_size), lambda i: (i, 0)),
        ),
        compiler_params=pltpu.CompilerParams(
            dimension_semantics=("parallel",),
        ),
    )(x_p, w1_p, b1_p, w2_p, b2)

    return out_padded[:B]


def init_plant_model_params(key, input_size, hidden_size, output_size):
    """Deterministic init matching torch.nn.Linear's default U(-1/sqrt(in), 1/sqrt(in))."""
    k1, k2, k3, k4 = jax.random.split(key, 4)
    bound1 = 1.0 / (input_size ** 0.5)
    bound2 = 1.0 / (hidden_size ** 0.5)
    # PyTorch stores weight as [out, in]; we keep [in, out] for the kernel.
    w1 = jax.random.uniform(k1, (input_size, hidden_size), jnp.float32, -bound1, bound1)
    b1 = jax.random.uniform(k2, (hidden_size,), jnp.float32, -bound1, bound1)
    w2 = jax.random.uniform(k3, (hidden_size, output_size), jnp.float32, -bound2, bound2)
    b2 = jax.random.uniform(k4, (output_size,), jnp.float32, -bound2, bound2)
    return w1, b1, w2, b2


if __name__ == "__main__":
    # Small shapes consistent with the module: inputSize=16, hiddenSize=32, outputSize=4.
    batch, input_size, hidden_size, output_size = 8, 16, 32, 4

    key = jax.random.PRNGKey(0)
    kx, kp = jax.random.split(key)
    x = jax.random.normal(kx, (batch, input_size), jnp.float32)
    w1, b1, w2, b2 = init_plant_model_params(kp, input_size, hidden_size, output_size)

    out = plant_model_forward(x, w1, b1, w2, b2)
    out = jax.block_until_ready(out)
    assert out.shape == (batch, output_size)

    # Reference in plain JAX with the same bf16 operand rounding + f32 accumulation.
    bf = lambda a: a.astype(jnp.bfloat16).astype(jnp.float32)
    h_ref = jnp.maximum(bf(x) @ bf(w1) + b1.reshape(1, -1), 0.0)
    ref = bf(h_ref) @ bf(w2) + b2.reshape(1, -1)
    assert jnp.allclose(out, ref, atol=1e-3, rtol=1e-3), (
        f"max abs err = {jnp.max(jnp.abs(out - ref))}")

    print("KERNEL_OK")
</pallas_src>

<mosaic_0001>
module attributes {stable_mosaic.version = 11 : i64} {
  func.func @_mlp_kernel(%arg0: i32, %arg1: memref<8x16xf32, #tpu.memory_space<vmem>>, %arg2: memref<16x128xbf16, #tpu.memory_space<vmem>>, %arg3: memref<1x128xf32, #tpu.memory_space<vmem>>, %arg4: memref<128x4xbf16, #tpu.memory_space<vmem>>, %arg5: memref<1x4xf32, #tpu.memory_space<vmem>>, %arg6: memref<8x4xf32, #tpu.memory_space<vmem>>) attributes {dimension_semantics = [#tpu.dimension_semantics<parallel>], iteration_bounds = array<i64: 1>, scalar_prefetch = 0 : i64, scratch_operands = 0 : i64, tpu.core_type = #tpu.core_type<tc>, window_params = [{transform_indices = @transform_0, window_bounds = array<i64: 8, 16>}, {pipeline_mode = #tpu.pipeline_mode<synchronous>, transform_indices = @transform_1, window_bounds = array<i64: 16, 128>}, {pipeline_mode = #tpu.pipeline_mode<synchronous>, transform_indices = @transform_2, window_bounds = array<i64: 1, 128>}, {pipeline_mode = #tpu.pipeline_mode<synchronous>, transform_indices = @transform_3, window_bounds = array<i64: 128, 4>}, {pipeline_mode = #tpu.pipeline_mode<synchronous>, transform_indices = @transform_4, window_bounds = array<i64: 1, 4>}, {transform_indices = @transform_5, window_bounds = array<i64: 8, 4>}]} {
    %c0 = arith.constant 0 : index
    %c0_0 = arith.constant 0 : index
    %0 = vector.load %arg1[%c0, %c0_0] : memref<8x16xf32, #tpu.memory_space<vmem>>, vector<8x16xf32>
    %1 = arith.truncf %0 : vector<8x16xf32> to vector<8x16xbf16>
    %c0_1 = arith.constant 0 : index
    %c0_2 = arith.constant 0 : index
    %2 = vector.load %arg2[%c0_1, %c0_2] : memref<16x128xbf16, #tpu.memory_space<vmem>>, vector<16x128xbf16>
    %cst = arith.constant dense<0.000000e+00> : vector<8x128xf32>
    %3 = tpu.matmul %1, %2, %cst {dimension_numbers = #tpu.dot_dimension_numbers<[1], [0], [0], [1], [0, 0, 1, 1], [], []>} : vector<8x16xbf16>, vector<16x128xbf16>, vector<8x128xf32> -> vector<8x128xf32>
    %c0_3 = arith.constant 0 : index
    %c0_4 = arith.constant 0 : index
    %4 = vector.load %arg3[%c0_3, %c0_4] : memref<1x128xf32, #tpu.memory_space<vmem>>, vector<1x128xf32>
    %5 = vector.broadcast %4 : vector<1x128xf32> to vector<8x128xf32>
    %6 = arith.addf %3, %5 : vector<8x128xf32>
    %cst_5 = arith.constant 0.000000e+00 : f32
    %7 = vector.broadcast %cst_5 : f32 to vector<8x128xf32>
    %8 = arith.maximumf %6, %7 : vector<8x128xf32>
    %9 = arith.truncf %8 : vector<8x128xf32> to vector<8x128xbf16>
    %c0_6 = arith.constant 0 : index
    %c0_7 = arith.constant 0 : index
    %10 = vector.load %arg4[%c0_6, %c0_7] : memref<128x4xbf16, #tpu.memory_space<vmem>>, vector<128x4xbf16>
    %cst_8 = arith.constant dense<0.000000e+00> : vector<8x4xf32>
    %11 = tpu.matmul %9, %10, %cst_8 {dimension_numbers = #tpu.dot_dimension_numbers<[1], [0], [0], [1], [0, 0, 1, 1], [], []>} : vector<8x128xbf16>, vector<128x4xbf16>, vector<8x4xf32> -> vector<8x4xf32>
    %c0_9 = arith.constant 0 : index
    %c0_10 = arith.constant 0 : index
    %12 = vector.load %arg5[%c0_9, %c0_10] : memref<1x4xf32, #tpu.memory_space<vmem>>, vector<1x4xf32>
    %13 = vector.broadcast %12 : vector<1x4xf32> to vector<8x4xf32>
    %14 = arith.addf %11, %13 : vector<8x4xf32>
    %c0_11 = arith.constant 0 : index
    %c0_12 = arith.constant 0 : index
    %15 = vector.load %arg6[%c0_11, %c0_12] : memref<8x4xf32, #tpu.memory_space<vmem>>, vector<8x4xf32>
    tpu.vector_store %arg6[%c0_11, %c0_12], %14 {strides = array<i32>} : memref<8x4xf32, #tpu.memory_space<vmem>>, vector<8x4xf32>,
    return
  }
  func.func @transform_0(%arg0: i32) -> (i32, i32) {
    %c0_i32 = arith.constant 0 : i32
    %c0_i32_0 = arith.constant 0 : i32
    return %arg0, %c0_i32 : i32, i32
  }
  func.func @transform_1(%arg0: i32) -> (i32, i32) {
    %c0_i32 = arith.constant 0 : i32
    %c0_i32_0 = arith.constant 0 : i32
    %c0_i32_1 = arith.constant 0 : i32
    return %c0_i32, %c0_i32_0 : i32, i32
  }
  func.func @transform_2(%arg0: i32) -> (i32, i32) {
    %c0_i32 = arith.constant 0 : i32
    %c0_i32_0 = arith.constant 0 : i32
    %c0_i32_1 = arith.constant 0 : i32
    return %c0_i32, %c0_i32_0 : i32, i32
  }
  func.func @transform_3(%arg0: i32) -> (i32, i32) {
    %c0_i32 = arith.constant 0 : i32
    %c0_i32_0 = arith.constant 0 : i32
    %c0_i32_1 = arith.constant 0 : i32
    return %c0_i32, %c0_i32_0 : i32, i32
  }
  func.func @transform_4(%arg0: i32) -> (i32, i32) {
    %c0_i32 = arith.constant 0 : i32
    %c0_i32_0 = arith.constant 0 : i32
    %c0_i32_1 = arith.constant 0 : i32
    return %c0_i32, %c0_i32_0 : i32, i32
  }
  func.func @transform_5(%arg0: i32) -> (i32, i32) {
    %c0_i32 = arith.constant 0 : i32
    %c0_i32_0 = arith.constant 0 : i32
    return %arg0, %c0_i32 : i32, i32
  }
}

</mosaic_0001>

<bundles_post_ra>
// kernel: plant_model_forward.1
= control target key start
LH: loop header
LB: loop body
LE: loop exit
PB: predicated region body
PF: predicated region fallthrough
CT: control target
= control target key end

     0   :  { %v261_v0 = vmov 0.0   ;;  %vm262_vm0 = vmmov 0   ;;  %vm38_vm1 = vcmask 130048   ;;  %vm195_vm2 = vcmask 31744   ;;  %s332_s1 = inlined_call_operand.vmem [shape: bf16[16,128], index: 1, kind: input, shape index: {}]   ;;  %s333_s0 = inlined_call_operand.vmem [shape: f32[8,16], index: 0, kind: input, shape index: {}]   ;;  %s334_s3 = inlined_call_operand.vmem [shape: bf16[128,4], index: 3, kind: input, shape index: {}]   ;;  %s335_s2 = inlined_call_operand.vmem [shape: f32[1,128], index: 2, kind: input, shape index: {}]   ;;  %s336_s4 = inlined_call_operand.vmem [shape: f32[1,4], index: 4, kind: input, shape index: {}]   ;;  %s337_s5 = inlined_call_operand.vmem [shape: f32[8,4], index: 5, kind: output, shape index: {}]  }
   0x1   :  { %224 = vmatprep.subr.bf16.mxu0 %v261_v0  ;;  %v252_v1 = vld [vmem:[%s332_s1] sm:$0xff]   ;;  %226 = vmatprep.mubr.msk.bf16.mxu0 %vm262_vm0, %v261_v0  ;;  %v254_v5 = vld [vmem:[%s334_s3 + $0x8] sm:$0xff]   ;;  %v255_v6 = vld [vmem:[%s334_s3 + $0x10] sm:$0xff]  }
   0x2   :  { %v21_v2 = vld [vmem:[%s333_s0] sm:$0xff]  ;;  %230 = vmatprep.subr.bf16.mxu1 %v261_v0  ;;  %246 = vmatprep.mubr.msk.bf16.mxu1 %vm262_vm0, %v261_v0  ;;  %v256_v7 = vld [vmem:[%s334_s3 + $0x18] sm:$0xff]   ;;  %v258_v9 = vld [vmem:[%s334_s3 + $0x28] sm:$0xff]  }
   0x3   :  { %225 = vmatpush3.bf16.msra.mxu0 %v252_v1  ;;  %v22_v3 = vpack.c.bf16 %v21_v2, %v21_v2  ;;  %v253_v4 = vld [vmem:[%s334_s3] sm:$0xff]   ;;  %v259_v10 = vld [vmem:[%s334_s3 + $0x30] sm:$0xff]   ;;  %v260_v11 = vld [vmem:[%s334_s3 + $0x38] sm:$0xff]  }
   0x4   :  { %231 = vmatpush3.bf16.msra.mxu1 %v253_v4  ;;  %v257_v8 = vld [vmem:[%s334_s3 + $0x20] sm:$0xff]  }
   0x5   :  { %232 = vmatprep.subr.bf16.mxu1 %v261_v0  ;;  %v201_v12 = vld [vmem:[%s335_s2] ss:$0 sm:$0xff] }
   0x6   :  { %227 = vmatmul.mubr.msk.bf16.vlgmr.msra.gmra.mrb[0].mxu0 %vm38_vm1, %v22_v3  ;;  %v204_v20 = vld [vmem:[%s336_s4] ss:$0 sm:$0xff] }
   0x8   :  { %233 = vmatpush3.bf16.msra.mxu1 %v254_v5 }
   0x9   :  { %234 = vmatprep.subr.bf16.mxu1 %v261_v0 }
   0xc   :  { %235 = vmatpush3.bf16.msra.mxu1 %v255_v6 }
   0xd   :  { %236 = vmatprep.subr.bf16.mxu1 %v261_v0 }
  0x10   :  { %237 = vmatpush3.bf16.msra.mxu1 %v256_v7 }
  0x11   :  { %238 = vmatprep.subr.bf16.mxu1 %v261_v0 }
  0x14   :  { %239 = vmatpush3.bf16.msra.mxu1 %v257_v8 }
  0x15   :  { %240 = vmatprep.subr.bf16.mxu1 %v261_v0 }
  0x18   :  { %241 = vmatpush3.bf16.msra.mxu1 %v258_v9 }
  0x19   :  { %242 = vmatprep.subr.bf16.mxu1 %v261_v0 }
  0x1c   :  { %243 = vmatpush3.bf16.msra.mxu1 %v259_v10 }
  0x1d   :  { %244 = vmatprep.subr.bf16.mxu1 %v261_v0 }
  0x20   :  { %245 = vmatpush3.bf16.msra.mxu1 %v260_v11 }
  0xd9   :  { %v76_v13 = vpop.f32.mrb[0].mxu0 }
  0xda   :  { %v77_v14 = vadd.f32 %v201_v12, %v76_v13  ;;  %v228_v15 = vpop.f32.mrb[1].mxu0 }
  0xdb   :  { %v79_v16 = vpop.f32.mrb[2].mxu0 }
  0xdc   :  { %v82_v17 = vmax.f32 %v77_v14, 0.0  ;;  %v229_v18 = vpop.f32.mrb[3].mxu0 }
  0xde   :  { %v83_v19 = vpack.c.bf16 %v82_v17, %v82_v17 }
  0xe0   :  { %247 = vmatmul.mubr.bf16.vlgmr.msra.gmra.mrb[0].mxu1 %v83_v19 }
 0x1b3   :  { %v189_v21 = vpop.f32.mrb[0].mxu1 }
 0x1b4   :  { %v190_v22 = vadd.f32 %v204_v20, %v189_v21  ;;  %v248_v23 = vpop.f32.mrb[1].mxu1 }
 0x1b5   :  { %v192_v24 = vpop.f32.mrb[2].mxu1 }
 0x1b6   :  { %196 = vst.msk [vmem:[%s337_s5] sm:$0xff] %vm195_vm2, %v190_v22  ;;  %v249_v25 = vpop.f32.mrb[3].mxu1 }

</bundles_post_ra>
